<compile_context>
chip_gen: v7x
topology: tpu7x:2x2x1
jax: 0.10.0
libtpu: 0.0.40
codegen_flags: <defaults>
</compile_context>

<pallas_src>
import functools

import jax
import jax.numpy as jnp
from jax import lax
from jax.experimental import pallas as pl
from jax.experimental.pallas import tpu as pltpu

_OUT_LANES = 128  # lane-dense writeback width (unmasked vst)


def _round_up(x, m):
    return (x + m - 1) // m * m


def _vmem_capacity_bytes():
    try:
        return int(pltpu.get_tpu_info().vmem_capacity_bytes)
    except Exception:
        return 64 * 1024 * 1024  # conservative (v7x-sized) fallback


def _contrastive_kernel(idx_ref, a_ref, pt_ref, inv_ref, pft_ref, o_ref, *,
                        normalize, use_bf16, batch):
    """Losses for batch rows [i*tm, (i+1)*tm) of the (padded) batch."""
    f32 = jnp.float32
    a = a_ref[...].astype(f32)            # (tm, D) anchor tile
    p_t = pt_ref[...].astype(f32)         # (tm, D) positive tile (same rows)
    tm = a.shape[0]
    Bp = pft_ref.shape[1]                 # padded batch = columns of sims
    K = idx_ref.shape[1]

    if normalize:
        # torch F.normalize: x / max(||x||, 1e-12) == x * rsqrt(max(ss, 1e-24))
        def l2n(x):
            ss = jnp.sum(x * x, axis=1, keepdims=True)
            return x * lax.rsqrt(jnp.maximum(ss, 1e-24))
        a = l2n(a)
        p_t = l2n(p_t)

    # positive_score = diag(sim01): cheap per-row dot on the VPU (f32).
    pos_score = jnp.sum(a * p_t, axis=1, keepdims=True)            # (tm, 1)

    # One fused MXU call against the RAW pre-transposed positive (already in
    # matmul dtype, resident, single-buffered).  The hoisted inverse norms are
    # applied as a column scale on the (2*tm, Bp) result — 2*tm*Bp multiplies
    # instead of re-normalizing (Bp, D) every grid step.
    md = jnp.bfloat16 if use_bf16 else f32
    lhs = jnp.concatenate([a.astype(md), p_t.astype(md)], axis=0)  # (2*tm, D)
    sims = jnp.dot(lhs, pft_ref[...], preferred_element_type=f32)  # (2*tm, Bp)
    if normalize:
        sims = sims * inv_ref[...]                                 # * 1/||p_j||
    sim01 = sims[:tm, :]                                           # (tm, Bp)
    sim00 = sims[tm:, :]                                           # (tm, Bp)

    # Map torch's off-diagonal gather indices (in [0, 2B-2)) onto columns.
    idx = idx_ref[...]                                             # (tm, K) int32
    row_g = (lax.broadcasted_iota(jnp.int32, (tm, K), 0)
             + pl.program_id(0) * tm)                              # global row id
    from01 = idx >= (batch - 1)                                    # which half
    m_local = idx - from01.astype(jnp.int32) * (batch - 1)
    col = m_local + (m_local >= row_g).astype(jnp.int32)           # skip diagonal

    # K-unrolled masked-sum gather over width Bp (no (tm, 2B) candidates slab).
    col_iota = lax.broadcasted_iota(jnp.int32, (tm, Bp), 1)
    neg_cols = []
    for k in range(K):                                             # K small, static
        src = jnp.where(from01[:, k:k + 1], sim01, sim00)          # per-row half
        hit = col_iota == col[:, k:k + 1]
        neg_cols.append(jnp.sum(jnp.where(hit, src, 0.0),
                                axis=1, keepdims=True))
    neg_scores = jnp.concatenate(neg_cols, axis=1)                 # (tm, K)

    # cross_entropy with label 0 == logsumexp([pos, negs]) - pos
    m = jnp.maximum(pos_score, jnp.max(neg_scores, axis=1, keepdims=True))
    sum_exp = jnp.exp(pos_score - m) + jnp.sum(jnp.exp(neg_scores - m),
                                               axis=1, keepdims=True)
    loss = m + jnp.log(sum_exp) - pos_score                        # (tm, 1)

    # Lane-dense writeback (unmasked vst): broadcast loss across the 128-lane
    # output block; wrapper reads column 0.
    o_ref[...] = jnp.broadcast_to(loss, (tm, o_ref.shape[1]))


def contrastive_loss(anchor, positive, neg_idx, *, normalize=True,
                     reduction="mean", use_bf16=True, block_m=None):
    """Pallas-TPU forward of ContrastiveLoss given precomputed negative indices."""
    B, D = anchor.shape
    K = neg_idx.shape[1]
    md = jnp.bfloat16 if use_bf16 else jnp.float32
    msize = jnp.dtype(md).itemsize

    # Generation-aware VMEM budget (v5e/v6e: 128 MiB physical, v7x: 64 MiB/TC).
    vmem_cap = _vmem_capacity_bytes()
    big_vmem = vmem_cap >= 96 * 1024 * 1024
    vmem_limit = (100 if big_vmem else 52) * 1024 * 1024

    # Batch-tile size: bigger tiles on v5e/v6e, 128 on v7x; always a multiple
    # of 8.  B is padded up to a multiple of tm so the tiled, megacore-parallel
    # path is kept for any batch size (no whole-batch fallback).
    if block_m is None:
        block_m = 512 if big_vmem else 128
    tm = max(8, min((block_m // 8) * 8, _round_up(B, 8)))
    Bp8 = _round_up(B, 8)

    def _vmem_estimate(tm_):
        resident = D * Bp8 * msize                       # positive^T, single-buffered
        tiles = 2 * (2 * tm_ * D * anchor.dtype.itemsize + tm_ * K * 4)
        temps = (2 * tm_ * Bp8 * 4) * 2 + 2 * tm_ * D * (4 + msize)
        return resident + tiles + temps + 2 * Bp8 * 4 + 2 * tm_ * _OUT_LANES * 4

    while tm > 128 and _vmem_estimate(tm) > 0.7 * vmem_limit:
        tm //= 2
    B_pad = _round_up(B, tm)
    grid = (B_pad // tm,)

    # Pad the batch; padded rows produce finite garbage losses, sliced off below.
    pad = B_pad - B
    anchor_p = jnp.pad(anchor, ((0, pad), (0, 0))) if pad else anchor
    positive_p = jnp.pad(positive, ((0, pad), (0, 0))) if pad else positive
    neg_idx32 = neg_idx.astype(jnp.int32)
    neg_idx_p = jnp.pad(neg_idx32, ((0, pad), (0, 0))) if pad else neg_idx32

    # Hoisted, one-time O(B*D) work (was redone every grid step before):
    #  * inverse L2 norms of the positives (applied as a column scale in-kernel)
    #  * positive pre-cast to the matmul dtype and pre-transposed to (D, B_pad)
    #    so the MXU consumes (2*tm, D) @ (D, B_pad) with no per-tile transpose.
    if normalize:
        ss = jnp.sum(positive_p.astype(jnp.float32) ** 2, axis=1)
        inv_norm = lax.rsqrt(jnp.maximum(ss, 1e-24)).reshape(1, B_pad)
    else:
        inv_norm = jnp.ones((1, B_pad), jnp.float32)
    pos_t = positive_p.astype(md).T                                # (D, B_pad)

    kernel = functools.partial(_contrastive_kernel, normalize=normalize,
                               use_bf16=use_bf16, batch=B)

    def _build(single_buffer_resident):
        res_kw = {}
        if single_buffer_resident and hasattr(pl, "Buffered"):
            res_kw["pipeline_mode"] = pl.Buffered(1)               # no double buffer
        return pl.pallas_call(
            kernel,
            out_shape=jax.ShapeDtypeStruct((B_pad, _OUT_LANES), jnp.float32),
            grid=grid,
            in_specs=[
                pl.BlockSpec((tm, K), lambda i: (i, 0)),           # negative indices
                pl.BlockSpec((tm, D), lambda i: (i, 0)),           # anchor tile
                pl.BlockSpec((tm, D), lambda i: (i, 0)),           # positive tile
                pl.BlockSpec((1, B_pad), lambda i: (0, 0)),        # 1/||p_j|| resident
                pl.BlockSpec((D, B_pad), lambda i: (0, 0), **res_kw),  # positive^T
            ],
            out_specs=pl.BlockSpec((tm, _OUT_LANES), lambda i: (i, 0)),
            compiler_params=pltpu.CompilerParams(
                dimension_semantics=("parallel",),                 # megacore sharding
                vmem_limit_bytes=vmem_limit,
            ),
        )

    args = (neg_idx_p, anchor_p, positive_p, inv_norm, pos_t)
    try:
        out = _build(True)(*args)
    except Exception:
        # pl.Buffered(1) not supported on this jax version: default buffering.
        out = _build(False)(*args)

    per = out[:B, 0]
    if reduction == "mean":
        return jnp.mean(per)
    if reduction == "sum":
        return jnp.sum(per)
    return per


def sample_negative_indices(key, B, num_negatives, replace=False):
    """Replicates the torch.rand-based negative sampling (indices only)."""
    K = min(B - 1, num_negatives)
    if replace:
        return jax.random.randint(key, (B, K), 0, 2 * B - 2, dtype=jnp.int32)
    k1, k2 = jax.random.split(key)
    r = jax.random.uniform(k1, (B, B - 1))
    _, idx = lax.top_k(r, K)                      # K distinct indices in [0, B-1)
    coin = jax.random.uniform(k2, (B, K)) > 0.5
    idx = jnp.where(coin, idx + (B - 1), idx)     # flip half into the sim01 half
    return idx.astype(jnp.int32)


def reference_loss(anchor, positive, neg_idx, normalize=True, reduction="mean"):
    """Pure-JAX f32 reference mirroring the PyTorch code path."""
    B = anchor.shape[0]
    if normalize:
        anchor = anchor / jnp.maximum(
            jnp.linalg.norm(anchor, axis=1, keepdims=True), 1e-12)
        positive = positive / jnp.maximum(
            jnp.linalg.norm(positive, axis=1, keepdims=True), 1e-12)
    sim01 = anchor @ positive.T
    sim00 = positive @ positive.T

    def off_diag(sim):
        return sim.flatten()[1:].reshape(B - 1, B + 1)[:, :-1].reshape(B, B - 1)

    pos_score = jnp.diagonal(sim01).reshape(B, 1)
    candidates = jnp.concatenate([off_diag(sim00), off_diag(sim01)], axis=1)
    neg_scores = jnp.take_along_axis(candidates, neg_idx, axis=1)
    scores = jnp.concatenate([pos_score, neg_scores], axis=1)
    per_sample = -jax.nn.log_softmax(scores, axis=1)[:, 0]
    if reduction == "mean":
        return jnp.mean(per_sample)
    if reduction == "sum":
        return jnp.sum(per_sample)
    return per_sample


if __name__ == "__main__":
    B, D = 16, 32
    num_negatives = 4

    key = jax.random.PRNGKey(0)
    ka, kp, kn = jax.random.split(key, 3)
    anchor = jax.random.normal(ka, (B, D), dtype=jnp.float32)
    positive = jax.random.normal(kp, (B, D), dtype=jnp.float32)
    neg_idx = sample_negative_indices(kn, B, num_negatives, replace=False)

    # Exact (f32-MXU) path, 2 batch tiles: must match the f32 reference tightly.
    loss_f32 = contrastive_loss(anchor, positive, neg_idx, normalize=True,
                                reduction="mean", use_bf16=False, block_m=8)
    loss_f32 = jax.block_until_ready(loss_f32)
    ref_mean = reference_loss(anchor, positive, neg_idx, True, "mean")
    assert jnp.allclose(loss_f32, ref_mean, rtol=1e-4, atol=1e-4), (loss_f32, ref_mean)

    per_f32 = contrastive_loss(anchor, positive, neg_idx, normalize=True,
                               reduction="none", use_bf16=False, block_m=8)
    per_f32 = jax.block_until_ready(per_f32)
    ref_none = reference_loss(anchor, positive, neg_idx, True, "none")
    assert jnp.allclose(per_f32, ref_none, rtol=1e-4, atol=1e-4), (per_f32, ref_none)

    # Fast (bf16-MXU, f32-accumulate) path: looser tolerance by design.
    loss_bf16 = contrastive_loss(anchor, positive, neg_idx, normalize=True,
                                 reduction="mean", use_bf16=True, block_m=8)
    loss_bf16 = jax.block_until_ready(loss_bf16)
    assert jnp.allclose(loss_bf16, ref_mean, rtol=3e-2, atol=3e-2), (loss_bf16, ref_mean)

    # Non-multiple batch (exercises the padding path instead of a whole-batch
    # fallback): B = 13 -> padded to 16, 2 tiles of 8.
    B2 = 13
    a2 = anchor[:B2]
    p2 = positive[:B2]
    n2 = sample_negative_indices(kn, B2, num_negatives, replace=False)
    loss_pad = contrastive_loss(a2, p2, n2, normalize=True,
                                reduction="mean", use_bf16=False, block_m=8)
    loss_pad = jax.block_until_ready(loss_pad)
    ref_pad = reference_loss(a2, p2, n2, True, "mean")
    assert jnp.allclose(loss_pad, ref_pad, rtol=1e-4, atol=1e-4), (loss_pad, ref_pad)

    print("KERNEL_OK")
</pallas_src>

<mosaic_0001>
module attributes {stable_mosaic.version = 11 : i64} {
  func.func @_contrastive_kernel(%arg0: i32, %arg1: memref<8x4xi32, #tpu.memory_space<vmem>>, %arg2: memref<8x32xf32, #tpu.memory_space<vmem>>, %arg3: memref<8x32xf32, #tpu.memory_space<vmem>>, %arg4: memref<1x16xf32, #tpu.memory_space<vmem>>, %arg5: memref<32x16xf32, #tpu.memory_space<vmem>>, %arg6: memref<8x128xf32, #tpu.memory_space<vmem>>) attributes {dimension_semantics = [#tpu.dimension_semantics<parallel>], iteration_bounds = array<i64: 2>, scalar_prefetch = 0 : i64, scratch_operands = 0 : i64, tpu.core_type = #tpu.core_type<tc>, window_params = [{transform_indices = @transform_0, window_bounds = array<i64: 8, 4>}, {transform_indices = @transform_1, window_bounds = array<i64: 8, 32>}, {transform_indices = @transform_2, window_bounds = array<i64: 8, 32>}, {pipeline_mode = #tpu.pipeline_mode<synchronous>, transform_indices = @transform_3, window_bounds = array<i64: 1, 16>}, {pipeline_mode = #tpu.pipeline_mode<synchronous>, transform_indices = @transform_4, window_bounds = array<i64: 32, 16>}, {transform_indices = @transform_5, window_bounds = array<i64: 8, 128>}]} {
    %c0 = arith.constant 0 : index
    %c0_0 = arith.constant 0 : index
    %0 = vector.load %arg2[%c0, %c0_0] : memref<8x32xf32, #tpu.memory_space<vmem>>, vector<8x32xf32>
    %c0_1 = arith.constant 0 : index
    %c0_2 = arith.constant 0 : index
    %1 = vector.load %arg3[%c0_1, %c0_2] : memref<8x32xf32, #tpu.memory_space<vmem>>, vector<8x32xf32>
    %2 = arith.mulf %0, %0 : vector<8x32xf32>
    %cst = arith.constant dense<0.000000e+00> : vector<8xf32>
    %3 = vector.multi_reduction <add>, %2, %cst [1] : vector<8x32xf32> to vector<8xf32>
    %4 = vector.shape_cast %3 : vector<8xf32> to vector<8x1xf32>
    %cst_3 = arith.constant 1.000000e-24 : f32
    %5 = vector.broadcast %cst_3 : f32 to vector<8x1xf32>
    %6 = arith.maximumf %4, %5 : vector<8x1xf32>
    %7 = math.rsqrt %6 : vector<8x1xf32>
    %8 = vector.broadcast %7 : vector<8x1xf32> to vector<8x32xf32>
    %9 = arith.mulf %0, %8 : vector<8x32xf32>
    %10 = arith.mulf %1, %1 : vector<8x32xf32>
    %cst_4 = arith.constant dense<0.000000e+00> : vector<8xf32>
    %11 = vector.multi_reduction <add>, %10, %cst_4 [1] : vector<8x32xf32> to vector<8xf32>
    %12 = vector.shape_cast %11 : vector<8xf32> to vector<8x1xf32>
    %cst_5 = arith.constant 1.000000e-24 : f32
    %13 = vector.broadcast %cst_5 : f32 to vector<8x1xf32>
    %14 = arith.maximumf %12, %13 : vector<8x1xf32>
    %15 = math.rsqrt %14 : vector<8x1xf32>
    %16 = vector.broadcast %15 : vector<8x1xf32> to vector<8x32xf32>
    %17 = arith.mulf %1, %16 : vector<8x32xf32>
    %18 = arith.mulf %9, %17 : vector<8x32xf32>
    %cst_6 = arith.constant dense<0.000000e+00> : vector<8xf32>
    %19 = vector.multi_reduction <add>, %18, %cst_6 [1] : vector<8x32xf32> to vector<8xf32>
    %20 = vector.shape_cast %19 : vector<8xf32> to vector<8x1xf32>
    %21 = tpu.concatenate %9, %17 in 0 : vector<8x32xf32>, vector<8x32xf32> -> vector<16x32xf32>
    %c0_7 = arith.constant 0 : index
    %c0_8 = arith.constant 0 : index
    %22 = vector.load %arg5[%c0_7, %c0_8] : memref<32x16xf32, #tpu.memory_space<vmem>>, vector<32x16xf32>
    %cst_9 = arith.constant dense<0.000000e+00> : vector<16x16xf32>
    %23 = tpu.matmul %21, %22, %cst_9 {dimension_numbers = #tpu.dot_dimension_numbers<[1], [0], [0], [1], [0, 0, 1, 1], [], []>} : vector<16x32xf32>, vector<32x16xf32>, vector<16x16xf32> -> vector<16x16xf32>
    %c0_10 = arith.constant 0 : index
    %c0_11 = arith.constant 0 : index
    %24 = vector.load %arg4[%c0_10, %c0_11] : memref<1x16xf32, #tpu.memory_space<vmem>>, vector<1x16xf32>
    %25 = vector.broadcast %24 : vector<1x16xf32> to vector<16x16xf32>
    %26 = arith.mulf %23, %25 : vector<16x16xf32>
    %27 = vector.extract_strided_slice %26 {offsets = [0, 0], sizes = [8, 16], strides = [1, 1]} : vector<16x16xf32> to vector<8x16xf32>
    %28 = vector.extract_strided_slice %26 {offsets = [8, 0], sizes = [8, 16], strides = [1, 1]} : vector<16x16xf32> to vector<8x16xf32>
    %c0_12 = arith.constant 0 : index
    %c0_13 = arith.constant 0 : index
    %29 = vector.load %arg1[%c0_12, %c0_13] : memref<8x4xi32, #tpu.memory_space<vmem>>, vector<8x4xi32>
    %30 = tpu.iota {dimensions = array<i32: 0>} : vector<8x4xi32>
    %c8_i32 = arith.constant 8 : i32
    %31 = arith.muli %arg0, %c8_i32 : i32
    %32 = vector.broadcast %31 : i32 to vector<8x4xi32>
    %33 = arith.addi %30, %32 : vector<8x4xi32>
    %c15_i32 = arith.constant 15 : i32
    %34 = vector.broadcast %c15_i32 : i32 to vector<8x4xi32>
    %35 = arith.cmpi sge, %29, %34 : vector<8x4xi32>
    %36 = arith.extui %35 : vector<8x4xi1> to vector<8x4xi32>
    %c15_i32_14 = arith.constant 15 : i32
    %37 = vector.broadcast %c15_i32_14 : i32 to vector<8x4xi32>
    %38 = arith.muli %36, %37 : vector<8x4xi32>
    %39 = arith.subi %29, %38 : vector<8x4xi32>
    %40 = arith.cmpi sge, %39, %33 : vector<8x4xi32>
    %41 = arith.extui %40 : vector<8x4xi1> to vector<8x4xi32>
    %42 = arith.addi %39, %41 : vector<8x4xi32>
    %43 = tpu.iota {dimensions = array<i32: 1>} : vector<8x16xi32>
    %44 = vector.extract_strided_slice %35 {offsets = [0, 0], sizes = [8, 1], strides = [1, 1]} : vector<8x4xi1> to vector<8x1xi1>
    %45 = vector.shape_cast %44 : vector<8x1xi1> to vector<8x1xi1>
    %46 = vector.broadcast %45 : vector<8x1xi1> to vector<8x16xi1>
    %47 = arith.select %46, %27, %28 : vector<8x16xi1>, vector<8x16xf32>
    %48 = vector.extract_strided_slice %42 {offsets = [0, 0], sizes = [8, 1], strides = [1, 1]} : vector<8x4xi32> to vector<8x1xi32>
    %49 = vector.broadcast %48 : vector<8x1xi32> to vector<8x16xi32>
    %50 = arith.cmpi eq, %43, %49 : vector<8x16xi32>
    %cst_15 = arith.constant 0.000000e+00 : f32
    %51 = vector.broadcast %cst_15 : f32 to vector<8x16xf32>
    %52 = arith.select %50, %47, %51 : vector<8x16xi1>, vector<8x16xf32>
    %cst_16 = arith.constant dense<0.000000e+00> : vector<8xf32>
    %53 = vector.multi_reduction <add>, %52, %cst_16 [1] : vector<8x16xf32> to vector<8xf32>
    %54 = vector.shape_cast %53 : vector<8xf32> to vector<8x1xf32>
    %55 = vector.extract_strided_slice %35 {offsets = [0, 1], sizes = [8, 1], strides = [1, 1]} : vector<8x4xi1> to vector<8x1xi1>
    %56 = vector.shape_cast %55 : vector<8x1xi1> to vector<8x1xi1>
    %57 = vector.broadcast %56 : vector<8x1xi1> to vector<8x16xi1>
    %58 = arith.select %57, %27, %28 : vector<8x16xi1>, vector<8x16xf32>
    %59 = vector.extract_strided_slice %42 {offsets = [0, 1], sizes = [8, 1], strides = [1, 1]} : vector<8x4xi32> to vector<8x1xi32>
    %60 = vector.broadcast %59 : vector<8x1xi32> to vector<8x16xi32>
    %61 = arith.cmpi eq, %43, %60 : vector<8x16xi32>
    %cst_17 = arith.constant 0.000000e+00 : f32
    %62 = vector.broadcast %cst_17 : f32 to vector<8x16xf32>
    %63 = arith.select %61, %58, %62 : vector<8x16xi1>, vector<8x16xf32>
    %cst_18 = arith.constant dense<0.000000e+00> : vector<8xf32>
    %64 = vector.multi_reduction <add>, %63, %cst_18 [1] : vector<8x16xf32> to vector<8xf32>
    %65 = vector.shape_cast %64 : vector<8xf32> to vector<8x1xf32>
    %66 = vector.extract_strided_slice %35 {offsets = [0, 2], sizes = [8, 1], strides = [1, 1]} : vector<8x4xi1> to vector<8x1xi1>
    %67 = vector.shape_cast %66 : vector<8x1xi1> to vector<8x1xi1>
    %68 = vector.broadcast %67 : vector<8x1xi1> to vector<8x16xi1>
    %69 = arith.select %68, %27, %28 : vector<8x16xi1>, vector<8x16xf32>
    %70 = vector.extract_strided_slice %42 {offsets = [0, 2], sizes = [8, 1], strides = [1, 1]} : vector<8x4xi32> to vector<8x1xi32>
    %71 = vector.broadcast %70 : vector<8x1xi32> to vector<8x16xi32>
    %72 = arith.cmpi eq, %43, %71 : vector<8x16xi32>
    %cst_19 = arith.constant 0.000000e+00 : f32
    %73 = vector.broadcast %cst_19 : f32 to vector<8x16xf32>
    %74 = arith.select %72, %69, %73 : vector<8x16xi1>, vector<8x16xf32>
    %cst_20 = arith.constant dense<0.000000e+00> : vector<8xf32>
    %75 = vector.multi_reduction <add>, %74, %cst_20 [1] : vector<8x16xf32> to vector<8xf32>
    %76 = vector.shape_cast %75 : vector<8xf32> to vector<8x1xf32>
    %77 = vector.extract_strided_slice %35 {offsets = [0, 3], sizes = [8, 1], strides = [1, 1]} : vector<8x4xi1> to vector<8x1xi1>
    %78 = vector.shape_cast %77 : vector<8x1xi1> to vector<8x1xi1>
    %79 = vector.broadcast %78 : vector<8x1xi1> to vector<8x16xi1>
    %80 = arith.select %79, %27, %28 : vector<8x16xi1>, vector<8x16xf32>
    %81 = vector.extract_strided_slice %42 {offsets = [0, 3], sizes = [8, 1], strides = [1, 1]} : vector<8x4xi32> to vector<8x1xi32>
    %82 = vector.broadcast %81 : vector<8x1xi32> to vector<8x16xi32>
    %83 = arith.cmpi eq, %43, %82 : vector<8x16xi32>
    %cst_21 = arith.constant 0.000000e+00 : f32
    %84 = vector.broadcast %cst_21 : f32 to vector<8x16xf32>
    %85 = arith.select %83, %80, %84 : vector<8x16xi1>, vector<8x16xf32>
    %cst_22 = arith.constant dense<0.000000e+00> : vector<8xf32>
    %86 = vector.multi_reduction <add>, %85, %cst_22 [1] : vector<8x16xf32> to vector<8xf32>
    %87 = vector.shape_cast %86 : vector<8xf32> to vector<8x1xf32>
    %88 = tpu.concatenate %54, %65, %76, %87 in 1 : vector<8x1xf32>, vector<8x1xf32>, vector<8x1xf32>, vector<8x1xf32> -> vector<8x4xf32>
    %cst_23 = arith.constant dense<0xFF800000> : vector<8xf32>
    %89 = vector.multi_reduction <maximumf>, %88, %cst_23 [1] : vector<8x4xf32> to vector<8xf32>
    %90 = vector.shape_cast %89 : vector<8xf32> to vector<8x1xf32>
    %91 = arith.maximumf %20, %90 : vector<8x1xf32>
    %92 = arith.subf %20, %91 : vector<8x1xf32>
    %93 = math.exp %92 : vector<8x1xf32>
    %94 = vector.broadcast %91 : vector<8x1xf32> to vector<8x4xf32>
    %95 = arith.subf %88, %94 : vector<8x4xf32>
    %96 = math.exp %95 : vector<8x4xf32>
    %cst_24 = arith.constant dense<0.000000e+00> : vector<8xf32>
    %97 = vector.multi_reduction <add>, %96, %cst_24 [1] : vector<8x4xf32> to vector<8xf32>
    %98 = vector.shape_cast %97 : vector<8xf32> to vector<8x1xf32>
    %99 = arith.addf %93, %98 : vector<8x1xf32>
    %100 = math.log %99 : vector<8x1xf32>
    %101 = arith.addf %91, %100 : vector<8x1xf32>
    %102 = arith.subf %101, %20 : vector<8x1xf32>
    %103 = vector.shape_cast %102 : vector<8x1xf32> to vector<8x1xf32>
    %104 = vector.broadcast %103 : vector<8x1xf32> to vector<8x128xf32>
    %c0_25 = arith.constant 0 : index
    %c0_26 = arith.constant 0 : index
    %105 = vector.load %arg6[%c0_25, %c0_26] : memref<8x128xf32, #tpu.memory_space<vmem>>, vector<8x128xf32>
    tpu.vector_store %arg6[%c0_25, %c0_26], %104 {strides = array<i32>} : memref<8x128xf32, #tpu.memory_space<vmem>>, vector<8x128xf32>,
    return
  }
  func.func @transform_0(%arg0: i32) -> (i32, i32) {
    %c0_i32 = arith.constant 0 : i32
    %c0_i32_0 = arith.constant 0 : i32
    return %arg0, %c0_i32 : i32, i32
  }
  func.func @transform_1(%arg0: i32) -> (i32, i32) {
    %c0_i32 = arith.constant 0 : i32
    %c0_i32_0 = arith.constant 0 : i32
    return %arg0, %c0_i32 : i32, i32
  }
  func.func @transform_2(%arg0: i32) -> (i32, i32) {
    %c0_i32 = arith.constant 0 : i32
    %c0_i32_0 = arith.constant 0 : i32
    return %arg0, %c0_i32 : i32, i32
  }
  func.func @transform_3(%arg0: i32) -> (i32, i32) {
    %c0_i32 = arith.constant 0 : i32
    %c0_i32_0 = arith.constant 0 : i32
    %c0_i32_1 = arith.constant 0 : i32
    return %c0_i32, %c0_i32_0 : i32, i32
  }
  func.func @transform_4(%arg0: i32) -> (i32, i32) {
    %c0_i32 = arith.constant 0 : i32
    %c0_i32_0 = arith.constant 0 : i32
    %c0_i32_1 = arith.constant 0 : i32
    return %c0_i32, %c0_i32_0 : i32, i32
  }
  func.func @transform_5(%arg0: i32) -> (i32, i32) {
    %c0_i32 = arith.constant 0 : i32
    %c0_i32_0 = arith.constant 0 : i32
    return %arg0, %c0_i32 : i32, i32
  }
}

module attributes {stable_mosaic.version = 11 : i64} {
  func.func @_contrastive_kernel(%arg0: i32, %arg1: memref<8x4xi32, #tpu.memory_space<vmem>>, %arg2: memref<8x32xf32, #tpu.memory_space<vmem>>, %arg3: memref<8x32xf32, #tpu.memory_space<vmem>>, %arg4: memref<1x16xf32, #tpu.memory_space<vmem>>, %arg5: memref<32x16xf32, #tpu.memory_space<vmem>>, %arg6: memref<8x128xf32, #tpu.memory_space<vmem>>) attributes {dimension_semantics = [#tpu.dimension_semantics<parallel>], iteration_bounds = array<i64: 2>, scalar_prefetch = 0 : i64, scratch_operands = 0 : i64, tpu.core_type = #tpu.core_type<tc>, window_params = [{transform_indices = @transform_0, window_bounds = array<i64: 8, 4>}, {transform_indices = @transform_1, window_bounds = array<i64: 8, 32>}, {transform_indices = @transform_2, window_bounds = array<i64: 8, 32>}, {pipeline_mode = #tpu.pipeline_mode<synchronous>, transform_indices = @transform_3, window_bounds = array<i64: 1, 16>}, {pipeline_mode = #tpu.pipeline_mode<synchronous>, transform_indices = @transform_4, window_bounds = array<i64: 32, 16>}, {transform_indices = @transform_5, window_bounds = array<i64: 8, 128>}]} {
    %c0 = arith.constant 0 : index
    %c0_0 = arith.constant 0 : index
    %0 = vector.load %arg2[%c0, %c0_0] : memref<8x32xf32, #tpu.memory_space<vmem>>, vector<8x32xf32>
    %c0_1 = arith.constant 0 : index
    %c0_2 = arith.constant 0 : index
    %1 = vector.load %arg3[%c0_1, %c0_2] : memref<8x32xf32, #tpu.memory_space<vmem>>, vector<8x32xf32>
    %2 = arith.mulf %0, %0 : vector<8x32xf32>
    %cst = arith.constant dense<0.000000e+00> : vector<8xf32>
    %3 = vector.multi_reduction <add>, %2, %cst [1] : vector<8x32xf32> to vector<8xf32>
    %4 = vector.shape_cast %3 : vector<8xf32> to vector<8x1xf32>
    %cst_3 = arith.constant 1.000000e-24 : f32
    %5 = vector.broadcast %cst_3 : f32 to vector<8x1xf32>
    %6 = arith.maximumf %4, %5 : vector<8x1xf32>
    %7 = math.rsqrt %6 : vector<8x1xf32>
    %8 = vector.broadcast %7 : vector<8x1xf32> to vector<8x32xf32>
    %9 = arith.mulf %0, %8 : vector<8x32xf32>
    %10 = arith.mulf %1, %1 : vector<8x32xf32>
    %cst_4 = arith.constant dense<0.000000e+00> : vector<8xf32>
    %11 = vector.multi_reduction <add>, %10, %cst_4 [1] : vector<8x32xf32> to vector<8xf32>
    %12 = vector.shape_cast %11 : vector<8xf32> to vector<8x1xf32>
    %cst_5 = arith.constant 1.000000e-24 : f32
    %13 = vector.broadcast %cst_5 : f32 to vector<8x1xf32>
    %14 = arith.maximumf %12, %13 : vector<8x1xf32>
    %15 = math.rsqrt %14 : vector<8x1xf32>
    %16 = vector.broadcast %15 : vector<8x1xf32> to vector<8x32xf32>
    %17 = arith.mulf %1, %16 : vector<8x32xf32>
    %18 = arith.mulf %9, %17 : vector<8x32xf32>
    %cst_6 = arith.constant dense<0.000000e+00> : vector<8xf32>
    %19 = vector.multi_reduction <add>, %18, %cst_6 [1] : vector<8x32xf32> to vector<8xf32>
    %20 = vector.shape_cast %19 : vector<8xf32> to vector<8x1xf32>
    %21 = tpu.concatenate %9, %17 in 0 : vector<8x32xf32>, vector<8x32xf32> -> vector<16x32xf32>
    %c0_7 = arith.constant 0 : index
    %c0_8 = arith.constant 0 : index
    %22 = vector.load %arg5[%c0_7, %c0_8] : memref<32x16xf32, #tpu.memory_space<vmem>>, vector<32x16xf32>
    %cst_9 = arith.constant dense<0.000000e+00> : vector<16x16xf32>
    %23 = tpu.matmul %21, %22, %cst_9 {dimension_numbers = #tpu.dot_dimension_numbers<[1], [0], [0], [1], [0, 0, 1, 1], [], []>} : vector<16x32xf32>, vector<32x16xf32>, vector<16x16xf32> -> vector<16x16xf32>
    %c0_10 = arith.constant 0 : index
    %c0_11 = arith.constant 0 : index
    %24 = vector.load %arg4[%c0_10, %c0_11] : memref<1x16xf32, #tpu.memory_space<vmem>>, vector<1x16xf32>
    %25 = vector.broadcast %24 : vector<1x16xf32> to vector<16x16xf32>
    %26 = arith.mulf %23, %25 : vector<16x16xf32>
    %27 = vector.extract_strided_slice %26 {offsets = [0, 0], sizes = [8, 16], strides = [1, 1]} : vector<16x16xf32> to vector<8x16xf32>
    %28 = vector.extract_strided_slice %26 {offsets = [8, 0], sizes = [8, 16], strides = [1, 1]} : vector<16x16xf32> to vector<8x16xf32>
    %c0_12 = arith.constant 0 : index
    %c0_13 = arith.constant 0 : index
    %29 = vector.load %arg1[%c0_12, %c0_13] : memref<8x4xi32, #tpu.memory_space<vmem>>, vector<8x4xi32>
    %30 = tpu.iota {dimensions = array<i32: 0>} : vector<8x4xi32>
    %c8_i32 = arith.constant 8 : i32
    %31 = arith.muli %arg0, %c8_i32 : i32
    %32 = vector.broadcast %31 : i32 to vector<8x4xi32>
    %33 = arith.addi %30, %32 : vector<8x4xi32>
    %c15_i32 = arith.constant 15 : i32
    %34 = vector.broadcast %c15_i32 : i32 to vector<8x4xi32>
    %35 = arith.cmpi sge, %29, %34 : vector<8x4xi32>
    %36 = arith.extui %35 : vector<8x4xi1> to vector<8x4xi32>
    %c15_i32_14 = arith.constant 15 : i32
    %37 = vector.broadcast %c15_i32_14 : i32 to vector<8x4xi32>
    %38 = arith.muli %36, %37 : vector<8x4xi32>
    %39 = arith.subi %29, %38 : vector<8x4xi32>
    %40 = arith.cmpi sge, %39, %33 : vector<8x4xi32>
    %41 = arith.extui %40 : vector<8x4xi1> to vector<8x4xi32>
    %42 = arith.addi %39, %41 : vector<8x4xi32>
    %43 = tpu.iota {dimensions = array<i32: 1>} : vector<8x16xi32>
    %44 = vector.extract_strided_slice %35 {offsets = [0, 0], sizes = [8, 1], strides = [1, 1]} : vector<8x4xi1> to vector<8x1xi1>
    %45 = vector.shape_cast %44 : vector<8x1xi1> to vector<8x1xi1>
    %46 = vector.broadcast %45 : vector<8x1xi1> to vector<8x16xi1>
    %47 = arith.select %46, %27, %28 : vector<8x16xi1>, vector<8x16xf32>
    %48 = vector.extract_strided_slice %42 {offsets = [0, 0], sizes = [8, 1], strides = [1, 1]} : vector<8x4xi32> to vector<8x1xi32>
    %49 = vector.broadcast %48 : vector<8x1xi32> to vector<8x16xi32>
    %50 = arith.cmpi eq, %43, %49 : vector<8x16xi32>
    %cst_15 = arith.constant 0.000000e+00 : f32
    %51 = vector.broadcast %cst_15 : f32 to vector<8x16xf32>
    %52 = arith.select %50, %47, %51 : vector<8x16xi1>, vector<8x16xf32>
    %cst_16 = arith.constant dense<0.000000e+00> : vector<8xf32>
    %53 = vector.multi_reduction <add>, %52, %cst_16 [1] : vector<8x16xf32> to vector<8xf32>
    %54 = vector.shape_cast %53 : vector<8xf32> to vector<8x1xf32>
    %55 = vector.extract_strided_slice %35 {offsets = [0, 1], sizes = [8, 1], strides = [1, 1]} : vector<8x4xi1> to vector<8x1xi1>
    %56 = vector.shape_cast %55 : vector<8x1xi1> to vector<8x1xi1>
    %57 = vector.broadcast %56 : vector<8x1xi1> to vector<8x16xi1>
    %58 = arith.select %57, %27, %28 : vector<8x16xi1>, vector<8x16xf32>
    %59 = vector.extract_strided_slice %42 {offsets = [0, 1], sizes = [8, 1], strides = [1, 1]} : vector<8x4xi32> to vector<8x1xi32>
    %60 = vector.broadcast %59 : vector<8x1xi32> to vector<8x16xi32>
    %61 = arith.cmpi eq, %43, %60 : vector<8x16xi32>
    %cst_17 = arith.constant 0.000000e+00 : f32
    %62 = vector.broadcast %cst_17 : f32 to vector<8x16xf32>
    %63 = arith.select %61, %58, %62 : vector<8x16xi1>, vector<8x16xf32>
    %cst_18 = arith.constant dense<0.000000e+00> : vector<8xf32>
    %64 = vector.multi_reduction <add>, %63, %cst_18 [1] : vector<8x16xf32> to vector<8xf32>
    %65 = vector.shape_cast %64 : vector<8xf32> to vector<8x1xf32>
    %66 = vector.extract_strided_slice %35 {offsets = [0, 2], sizes = [8, 1], strides = [1, 1]} : vector<8x4xi1> to vector<8x1xi1>
    %67 = vector.shape_cast %66 : vector<8x1xi1> to vector<8x1xi1>
    %68 = vector.broadcast %67 : vector<8x1xi1> to vector<8x16xi1>
    %69 = arith.select %68, %27, %28 : vector<8x16xi1>, vector<8x16xf32>
    %70 = vector.extract_strided_slice %42 {offsets = [0, 2], sizes = [8, 1], strides = [1, 1]} : vector<8x4xi32> to vector<8x1xi32>
    %71 = vector.broadcast %70 : vector<8x1xi32> to vector<8x16xi32>
    %72 = arith.cmpi eq, %43, %71 : vector<8x16xi32>
    %cst_19 = arith.constant 0.000000e+00 : f32
    %73 = vector.broadcast %cst_19 : f32 to vector<8x16xf32>
    %74 = arith.select %72, %69, %73 : vector<8x16xi1>, vector<8x16xf32>
    %cst_20 = arith.constant dense<0.000000e+00> : vector<8xf32>
    %75 = vector.multi_reduction <add>, %74, %cst_20 [1] : vector<8x16xf32> to vector<8xf32>
    %76 = vector.shape_cast %75 : vector<8xf32> to vector<8x1xf32>
    %77 = vector.extract_strided_slice %35 {offsets = [0, 3], sizes = [8, 1], strides = [1, 1]} : vector<8x4xi1> to vector<8x1xi1>
    %78 = vector.shape_cast %77 : vector<8x1xi1> to vector<8x1xi1>
    %79 = vector.broadcast %78 : vector<8x1xi1> to vector<8x16xi1>
    %80 = arith.select %79, %27, %28 : vector<8x16xi1>, vector<8x16xf32>
    %81 = vector.extract_strided_slice %42 {offsets = [0, 3], sizes = [8, 1], strides = [1, 1]} : vector<8x4xi32> to vector<8x1xi32>
    %82 = vector.broadcast %81 : vector<8x1xi32> to vector<8x16xi32>
    %83 = arith.cmpi eq, %43, %82 : vector<8x16xi32>
    %cst_21 = arith.constant 0.000000e+00 : f32
    %84 = vector.broadcast %cst_21 : f32 to vector<8x16xf32>
    %85 = arith.select %83, %80, %84 : vector<8x16xi1>, vector<8x16xf32>
    %cst_22 = arith.constant dense<0.000000e+00> : vector<8xf32>
    %86 = vector.multi_reduction <add>, %85, %cst_22 [1] : vector<8x16xf32> to vector<8xf32>
    %87 = vector.shape_cast %86 : vector<8xf32> to vector<8x1xf32>
    %88 = tpu.concatenate %54, %65, %76, %87 in 1 : vector<8x1xf32>, vector<8x1xf32>, vector<8x1xf32>, vector<8x1xf32> -> vector<8x4xf32>
    %cst_23 = arith.constant dense<0xFF800000> : vector<8xf32>
    %89 = vector.multi_reduction <maximumf>, %88, %cst_23 [1] : vector<8x4xf32> to vector<8xf32>
    %90 = vector.shape_cast %89 : vector<8xf32> to vector<8x1xf32>
    %91 = arith.maximumf %20, %90 : vector<8x1xf32>
    %92 = arith.subf %20, %91 : vector<8x1xf32>
    %93 = math.exp %92 : vector<8x1xf32>
    %94 = vector.broadcast %91 : vector<8x1xf32> to vector<8x4xf32>
    %95 = arith.subf %88, %94 : vector<8x4xf32>
    %96 = math.exp %95 : vector<8x4xf32>
    %cst_24 = arith.constant dense<0.000000e+00> : vector<8xf32>
    %97 = vector.multi_reduction <add>, %96, %cst_24 [1] : vector<8x4xf32> to vector<8xf32>
    %98 = vector.shape_cast %97 : vector<8xf32> to vector<8x1xf32>
    %99 = arith.addf %93, %98 : vector<8x1xf32>
    %100 = math.log %99 : vector<8x1xf32>
    %101 = arith.addf %91, %100 : vector<8x1xf32>
    %102 = arith.subf %101, %20 : vector<8x1xf32>
    %103 = vector.shape_cast %102 : vector<8x1xf32> to vector<8x1xf32>
    %104 = vector.broadcast %103 : vector<8x1xf32> to vector<8x128xf32>
    %c0_25 = arith.constant 0 : index
    %c0_26 = arith.constant 0 : index
    %105 = vector.load %arg6[%c0_25, %c0_26] : memref<8x128xf32, #tpu.memory_space<vmem>>, vector<8x128xf32>
    tpu.vector_store %arg6[%c0_25, %c0_26], %104 {strides = array<i32>} : memref<8x128xf32, #tpu.memory_space<vmem>>, vector<8x128xf32>,
    return
  }
  func.func @transform_0(%arg0: i32) -> (i32, i32) {
    %c0_i32 = arith.constant 0 : i32
    %c0_i32_0 = arith.constant 0 : i32
    return %arg0, %c0_i32 : i32, i32
  }
  func.func @transform_1(%arg0: i32) -> (i32, i32) {
    %c0_i32 = arith.constant 0 : i32
    %c0_i32_0 = arith.constant 0 : i32
    return %arg0, %c0_i32 : i32, i32
  }
  func.func @transform_2(%arg0: i32) -> (i32, i32) {
    %c0_i32 = arith.constant 0 : i32
    %c0_i32_0 = arith.constant 0 : i32
    return %arg0, %c0_i32 : i32, i32
  }
  func.func @transform_3(%arg0: i32) -> (i32, i32) {
    %c0_i32 = arith.constant 0 : i32
    %c0_i32_0 = arith.constant 0 : i32
    %c0_i32_1 = arith.constant 0 : i32
    return %c0_i32, %c0_i32_0 : i32, i32
  }
  func.func @transform_4(%arg0: i32) -> (i32, i32) {
    %c0_i32 = arith.constant 0 : i32
    %c0_i32_0 = arith.constant 0 : i32
    %c0_i32_1 = arith.constant 0 : i32
    return %c0_i32, %c0_i32_0 : i32, i32
  }
  func.func @transform_5(%arg0: i32) -> (i32, i32) {
    %c0_i32 = arith.constant 0 : i32
    %c0_i32_0 = arith.constant 0 : i32
    return %arg0, %c0_i32 : i32, i32
  }
}

</mosaic_0001>

<bundles_post_ra>
// kernel: tpu_custom_call.1
= control target key start
LH: loop header
LB: loop body
LE: loop exit
PB: predicated region body
PF: predicated region fallthrough
CT: control target
= control target key end

     0   :  { %10 = vsyncpa [#allocation3], 0  ;;  %s888_s0 = inlined_call_operand.vmem [shape: s32[16,4], index: 0, kind: input, shape index: {}]   ;;  %s889_s1 = inlined_call_operand.vmem [shape: f32[16,32], index: 1, kind: input, shape index: {}]   ;;  %s890_s2 = inlined_call_operand.vmem [shape: f32[16,32], index: 2, kind: input, shape index: {}]   ;;  %s891_s3 = inlined_call_operand.vmem [shape: f32[1,16], index: 3, kind: input, shape index: {}]   ;;  %s892_s4 = inlined_call_operand.vmem [shape: f32[32,16], index: 4, kind: input, shape index: {}]   ;;  %s893_s5 = inlined_call_operand.hbm [shape: f32[16,128], index: 5, kind: output, shape index: {}]  }
   0x1   :  { %12 = vsyncpa [#allocation3 + $0x1], 0  ;;  %s761_s18 = smov 0   ;;  %s763_s19 = smov 0  }
   0x2   :  { %s765_s20 = smov 0   ;;  %s767_s21 = smov 0  }
   0x3 LB: > { %s782_s22 = sadd.s32 4294967295, %s724_s21   ;;  %s560_s23 = sadd.s32 4294967294, %s724_s21   ;;  %s724_s21 = sphi %s767_s21, %s899_s21   ;;  %s720_s20 = sphi %s765_s20, %s898_s20   ;;  %s716_s19 = sphi %s763_s19, %s897_s19   ;;  %s712_s18 = sphi %s761_s18, %s896_s18  }
   0x4   : > { %s786_s24 = sadd.s32 1, %s724_s21   ;;  %s145_s25 = sadd.s32 1, %s720_s20 }
   0x5   : > { %s142_s26 = ssub.s32 %s724_s21, %s786_s24  ;;  %p155_p0 = scmp.ne.s32.totalorder %s720_s20, %s716_s19 }
   0x6   : > { %p143_p1 = scmp.eq.s32.totalorder %s142_s26, 0  ;;  %p156_p2 = scmp.eq.s32.totalorder %s782_s22, 1 }
   0x7   : > { %p161_p3 = scmp.ne.s32.totalorder %s716_s19, %s712_s18  ;;  %p162_p4 = scmp.eq.s32.totalorder %s560_s23, 1 }
   0x8   : > { %s797_s27 = scalar_select %p143_p1, %s720_s20, %s145_s25  }
   0x9   : > { %p799_p5 = por %p156_p2, %p155_p0  ;;  %p803_p6 = por %p162_p4, %p161_p3 }
   0xa   : > { %p563_p7 = scmp.ge.s32.totalorder %s724_s21, 1  ;;  %p207_p8 = scmp.lt.s32.totalorder %s724_s21, 3 }
   0xc   : > { %p208_p9 = pnand %p563_p7, %p207_p8 }
   0xd   : > { %p242_p10 = scmp.lt.s32.totalorder (!%p208_p9), %s782_s22, 1  ;;  %vm257_vm0 = vcmask (!%p208_p9), 261120   ;;  %v275_v6 = vld [vmem:[%s892_s4] sm:$0xff] (!%p208_p9)  ;;  %v276_v7 = vld [vmem:[%s892_s4 + $0x8] sm:$0xff] (!%p208_p9)  ;;  %v277_v8 = vld [vmem:[%s892_s4 + $0x10] sm:$0xff] (!%p208_p9)  ;;  %v370_v13 = vlaneseq (!%p208_p9)  ;;  %v726_v14 = vmov (!%p208_p9), 0  }
   0xe   : > { %211 = sbr.rel (%p208_p9) target bundleno = 895 (0x37f), region = 40  ;;  %v593_v9 = vpack.c.bf16 (!%p208_p9), %v276_v7, %v275_v6  ;;  %v278_v10 = vld [vmem:[%s892_s4 + $0x18] sm:$0xff] (!%p208_p9)  ;;  %644 = vset.pattern.permute.xlu1 (!%p208_p9), %v726_v14  ;;  %646 = vset.pattern.permute.xlu0 (!%p208_p9), %v726_v14  ;;  %v727_v21 = vmov (!%p208_p9), 1   ;;  %v728_v24 = vmov (!%p208_p9), 2   ;;  %v729_v25 = vmov (!%p208_p9), 3   ;;  %s239_s11 = sand.u32 (!%p208_p9), 1, %s716_s19  }
   0xf   : > { %v597_v11 = vpack.c.bf16 (!%p208_p9), %v278_v10, %v277_v8  ;;  %v371_v17 = vshrl.u32 (!%p208_p9), %v370_v13, 7  ;;  %v570_v41 = vld [vmem:[%s891_s3] ss:$0 sm:$0xff] (!%p208_p9)  ;;  %v383_v42 = vand.u32 (!%p208_p9), 127, %v370_v13  ;;  %vm394_vm11 = vcmask (!%p208_p9), 130048   ;;  %s573_s13 = sshll.u32 (!%p208_p9), %s782_s22, 7 }
  0x10   : > { %594 = vmatprep.subr.bf16.mxu0 (!%p208_p9), %v593_v9  ;;  %vm437_vm12 = vcmask (!%p208_p9), 7168   ;;  %vm439_vm13 = vcmask (!%p208_p9), 15360   ;;  %vm441_vm14 = vcmask (!%p208_p9), 23552   ;;  %vm443_vm15 = vcmask (!%p208_p9), 31744   ;;  %s846_s23 = scalar_lea.hbm (!%p208_p9), %s893_s5, %s573_s13  ;;  %s464_s25 = scalar_lea.sflag (!%p208_p9), [#allocation3], %s239_s11 }
  0x11   : > { %596 = vmatpush3.bf16.msra.mxu0 (!%p208_p9), %v593_v9 }
  0x12   : > { %598 = vmatprep.subr.bf16.mxu0 (!%p208_p9), %v597_v11 }
  0x15   : > { %s243_s30 = scalar_select %p242_p10, %s782_s22, 1  ;;  %600 = vmatpush3.bf16.msra.mxu0 %v597_v11 }
  0x17   : > { %s565_s6 = sshll.u32 %s243_s30, 3 }
  0x18   : > { %s249_s9 = scalar_lea.vmem %s889_s1, %s565_s6  ;;  %s253_s12 = scalar_lea.vmem %s890_s2, %s565_s6 }
  0x19   : > { %v254_v0 = vld [vmem:[%s249_s9] sm:$0xff]  ;;  %s245_s8 = scalar_lea.vmem %s888_s0, %s565_s6  ;;  %s571_s9 = sshll.u32 %s782_s22, 3 }
  0x1a   : > { %v256_v1 = vmul.f32 %v254_v0, %v254_v0  ;;  %v255_v2 = vld [vmem:[%s253_s12] sm:$0xff]  ;;  %v373_v15 = vstv %s571_s9  ;;  %s564_s12 = sshll.u32 %s239_s11, 3  ;;  %s730_s22 = smov [#allocation2]  }
  0x1b   : > { %v264_v3 = vmul.f32 %v255_v2, %v255_v2  ;;  %v369_v12 = vld [vmem:[%s245_s8] sm:$0xff]  ;;  %v374_v19 = vadd.s32 %v373_v15, %v371_v17  ;;  %s241_s14 = scalar_lea.vmem [#allocation2], %s564_s12  ;;  %s666_s30 = sshll.u32 %s730_s22, 4  ;;  %s667_s30 = int_to_ptr.vmem [resolvable:$false] %s666_s30 }
  0x1c   : > { %v258_v4 = vsel %vm257_vm0, %v256_v1, 0.0  ;;  %vm375_vm1 = vcmp.ge.s32.totalorder %v369_v12, 15  ;;  %s477_s15 = sshll.u32 %s241_s14, 4  ;;  %s668_s7 = scalar_lea.vmem %s667_s30, 256  ;;  %s848_s15 = int_to_ptr.vmem [resolvable:$true] %s477_s15 }
  0x1d   : > { %259 = vadd.xlane.f32.xlu0 %v258_v4  ;;  %v265_v5 = vsel %vm257_vm0, %v264_v3, 0.0  ;;  %v376_v16 = vsel %vm375_vm1, 1, %v726_v14  ;;  %s662_s26 = scalar_lea.vmem %s848_s15, 128  ;;  %p669_p0 = scmp.lt.s32.totalorder %s848_s15, %s667_s30 }
  0x1e   : > { %385 = vperm.xlu1 %644, %v376_v16   ;;  %v377_v18 = vmul.u32 15, %v376_v16  ;;  %p663_p11 = scmp.ne.s32.totalorder %s848_s15, %s662_s26  ;;  %p670_p1 = scmp.lt.s32.totalorder %s668_s7, %s662_s26 }
  0x20   : > { %v378_v20 = vsub.s32 %v369_v12, %v377_v18  ;;  %p664_p12 = pnand %p663_p11, %p799_p5  ;;  %p671_p2 = por %p670_p1, %p669_p0 }
  0x21   : > { %266 = vadd.xlane.f32.xlu0 %v265_v5 }
  0x22   : > { %645 = vset.pattern.permute.xlu1 %v727_v21  ;;  %vm379_vm2 = vcmp.ge.s32.totalorder %v378_v20, %v374_v19  ;;  %p665_p13 = pneg %p664_p12 }
  0x23   : > { %399 = vperm.xlu1 %645, %v376_v16   ;;  %v380_v22 = vsel %vm379_vm2, 1, %v726_v14 }
  0x24   : > { %v381_v23 = vadd.s32 %v380_v22, %v378_v20  ;;  %p672_p3 = pnand %p671_p2, %p665_p13 }
  0x27   : > { %647 = vset.pattern.permute.xlu1 %v728_v24 }
  0x28   : > { %412 = vperm.xlu1 %647, %v376_v16  }
  0x2c   : > { %648 = vset.pattern.permute.xlu1 %v727_v21 }
  0x2d   : > { %404 = vperm.xlu1 %648, %v381_v23  }
  0x31   : > { %649 = vset.pattern.permute.xlu1 %v728_v24 }
  0x32   : > { %417 = vperm.xlu1 %649, %v381_v23  }
  0x36   : > { %650 = vset.pattern.permute.xlu1 %v729_v25 }
  0x37   : > { %390 = vperm.xlu0 %646, %v381_v23   ;;  %425 = vperm.xlu1 %650, %v376_v16  }
  0x3b   : > { %651 = vset.pattern.permute.xlu0 %v729_v25  ;;  %430 = vperm.xlu1 %650, %v381_v23  }
  0x9d   : > { %v386_v35 = vpop.permute.xlu1 %385 }
  0x9e   : > { %vm387_vm3 = vcmp.eq.s32.totalorder %v386_v35, 1 }
  0xa2   : > { %v400_v36 = vpop.permute.xlu1 %399 }
  0xa3   : > { %vm401_vm8 = vcmp.eq.s32.totalorder %v400_v36, 1 }
  0xa7   : > { %v413_v37 = vpop.permute.xlu1 %412 }
  0xa8   : > { %vm414_vm9 = vcmp.eq.s32.totalorder %v413_v37, 1 }
  0xaa   : > { %v260_v26 = vpop.xlane.xlu0 %259 }
  0xab   : > { %v261_v27 = vmax.f32 %v260_v26, 1e-24 }
  0xac   : > { %v405_v38 = vpop.permute.xlu1 %404 }
  0xad   : > { %652 = vrsqrt.f32 %v261_v27  ;;  %vm406_vm10 = vcmp.eq.s32.totalorder %v383_v42, %v405_v38 }
  0xae   : > { %v267_v28 = vpop.xlane.xlu0 %266 }
  0xaf   : > { %v268_v29 = vmax.f32 %v267_v28, 1e-24 }
  0xb1   : > { %654 = vrsqrt.f32 %v268_v29  ;;  %v418_v39 = vpop.permute.xlu1 %417 }
  0xb2   : > { %vm419_vm5 = vcmp.eq.s32.totalorder %v383_v42, %v418_v39 }
  0xb6   : > { %v426_v40 = vpop.permute.xlu1 %425  ;;  %v391_v44 = vpop.permute.xlu0 %390 }
  0xb7   : > { %v653_v30 = vpop.eup %652  ;;  %vm427_vm4 = vcmp.eq.s32.totalorder %v426_v40, 1  ;;  %vm392_vm7 = vcmp.eq.s32.totalorder %v383_v42, %v391_v44 }
  0xb8   : > { %v263_v31 = vmul.f32 %v653_v30, %v254_v0 }
  0xba   : > { %590 = vmatprep.mubr.msk.f32.mxu0 %vm257_vm0, %v263_v31  ;;  %v431_v43 = vpop.permute.xlu1 %430 }
  0xbb   : > { %v655_v32 = vpop.eup %654  ;;  %vm432_vm6 = vcmp.eq.s32.totalorder %v383_v42, %v431_v43 }
  0xbc   : > { %v270_v33 = vmul.f32 %v655_v32, %v255_v2 }
  0xbe   : > { %591 = vmatmul.mubr.msk.f32.vlgmr.msra.gmra.mrb[0].mxu0 %vm257_vm0, %v270_v33  ;;  %v271_v34 = vmul.f32 %v270_v33, %v263_v31 }
  0xc0   : > { %v272_v61 = vsel %vm257_vm0, %v271_v34, 0.0 }
 0x191   : > { %v592_v45 = vpop.f32.mrb[0].mxu0 }
 0x192   : > { %v368_v46 = vmul.f32 %v592_v45, %v570_v41  ;;  %v351_v47 = vpop.f32.mrb[1].mxu0 }
 0x193   : > { %v367_v48 = vmul.f32 %v570_v41, %v351_v47 }
 0x195   : > { %v402_v49 = vsel %vm401_vm8, %v367_v48, %v368_v46  ;;  %v388_v50 = vsel %vm387_vm3, %v367_v48, %v368_v46  ;;  %v415_v51 = vsel %vm414_vm9, %v367_v48, %v368_v46  ;;  %v428_v52 = vsel %vm427_vm4, %v367_v48, %v368_v46 }
 0x196   : > { %v407_v53 = vsel %vm406_vm10, %v402_v49, 0.0  ;;  %v393_v54 = vsel %vm392_vm7, %v388_v50, 0.0  ;;  %v420_v55 = vsel %vm419_vm5, %v415_v51, 0.0  ;;  %v433_v56 = vsel %vm432_vm6, %v428_v52, 0.0 }
 0x197   : > { %v408_v57 = vsel %vm394_vm11, %v407_v53, 0.0  ;;  %v395_v58 = vsel %vm394_vm11, %v393_v54, 0.0  ;;  %v421_v59 = vsel %vm394_vm11, %v420_v55, 0.0  ;;  %v434_v60 = vsel %vm394_vm11, %v433_v56, 0.0 }
 0x198   : > { %409 = vadd.xlane.f32.xlu0 %v408_v57  ;;  %396 = vadd.xlane.f32.xlu1 %v395_v58 }
 0x19c   : > { %422 = vadd.xlane.f32.xlu1 %v421_v59 }
 0x1a0   : > { %435 = vadd.xlane.f32.xlu1 %v434_v60 }
 0x1a4   : > { %273 = vadd.xlane.f32.xlu1 %v272_v61 }
 0x225   : > { %v397_v62 = vpop.xlane.xlu1 %396  ;;  %v410_v63 = vpop.xlane.xlu0 %409 }
 0x226   : > { %v438_v1 = vsel %vm437_vm12, %v397_v62, %v410_v63 }
 0x229   : > { %v423_v0 = vpop.xlane.xlu1 %422 }
 0x22a   : > { %v440_v2 = vsel %vm439_vm13, %v438_v1, %v423_v0 }
 0x22d   : > { %v436_v3 = vpop.xlane.xlu1 %435 }
 0x22e   : > { %v442_v4 = vsel %vm441_vm14, %v440_v2, %v436_v3 }
 0x22f   : > { %v444_v5 = vsel %vm443_vm15, %v442_v4, -inf }
 0x230   : > { %445 = vmax.xlane.f32.xlu1 %v444_v5 }
 0x231   : > { %v274_v6 = vpop.xlane.xlu1 %273 }
 0x2bd   : > { %v446_v7 = vpop.xlane.xlu1 %445 }
 0x2be   : > { %v447_v8 = vmax.f32 %v274_v6, %v446_v7 }
 0x2c0   : > { %v451_v9 = vsub.f32 %v442_v4, %v447_v8  ;;  %v448_v13 = vsub.f32 %v274_v6, %v447_v8 }
 0x2c2   : > { %v452_v10 = vmul.f32 1.442695, %v451_v9  ;;  %v449_v14 = vmul.f32 1.442695, %v448_v13 }
 0x2c4   : > { %656 = vpow2.f32 %v452_v10 }
 0x2c5   : > { %658 = vpow2.f32 %v449_v14 }
 0x2ce   : > { %v657_v11 = vpop.eup %656 }
 0x2cf   : > { %v454_v12 = vsel %vm443_vm15, %v657_v11, 0.0  ;;  %v659_v15 = vpop.eup %658 }
 0x2d0   : > { %455 = vadd.xlane.f32.xlu1 %v454_v12 }
 0x35d   : > { %v456_v16 = vpop.xlane.xlu1 %455 }
 0x35e   : > { %v457_v17 = vadd.f32 %v659_v15, %v456_v16 }
 0x360   : > { %660 = vlog2.f32 %v457_v17 }
 0x36a   : > { %v661_v18 = vpop.eup %660 }
 0x36b   : > { %v459_v19 = vmul.f32 0.6931472, %v661_v18 }
 0x36d   : > { %v460_v20 = vadd.f32 %v459_v19, %v447_v8 }
 0x36f   : > { %v461_v21 = vsub.f32 %v460_v20, %v274_v6 }
 0x371   : > { %462 = vst [vmem:[%s241_s14] sm:$0xff] %v461_v21 }
 0x372   : > { %675 = shalt.err (!%p672_p3)
}
 0x373   : > { %s676_s8 = scalar_lea.hbm %s846_s23, 128  ;;  %s680_s10 = scalar_lea.hbm %s893_s5, 256 }
 0x374   : > { %p677_p4 = scmp.ne.s32.totalorder %s846_s23, %s676_s8  ;;  %p681_p9 = scmp.lt.u32.totalorder %s846_s23, %s893_s5 }
 0x375   : > { %p682_p10 = scmp.lt.u32.totalorder %s680_s10, %s676_s8  ;;  %p684_p12 = scmp.lt.u32.totalorder %s676_s8, %s846_s23 }
 0x376   : > { %p678_p7 = pnand %p677_p4, %p799_p5 }
 0x377   : > { %p683_p11 = por %p682_p10, %p681_p9 }
 0x378   : > { %p679_p8 = pneg %p678_p7 }
 0x379   : > { %p685_p13 = por %p684_p12, %p683_p11 }
 0x37b   : > { %p686_p0 = pnand %p685_p13, %p679_p8 }
 0x37d   : > { %689 = shalt.err (!%p686_p0)
}
 0x37e   : > { %601 = dma.vmem_to_hbm [thread:$0]  (%p799_p5), %s848_s15, 128, %s846_s23, %s464_s25  }
 0x37f PF: > { %p607_p1 = scmp.ge.s32.totalorder %s724_s21, 2  ;;  %s489_s13 = sand.u32 1, %s712_s18  }
 0x380   : > { %s490_s14 = scalar_lea.sflag [#allocation3], %s489_s13 }
 0x381   : > { %p604_p2 = pnand %p607_p1, %p803_p6 }
 0x383   : > { %707 = dma.done.wait (!%p604_p2), %s490_s14, 128  }
 0x384   : > { %709 = vsyncadd (!%p604_p2), %s490_s14, 4294967168  ;;  %p15_p3 = scmp.ge.s32.totalorder %s786_s24, 4   ;;  %s896_s18 = smov %s716_s19 }
 0x385   : > { %s897_s19 = smov %s720_s20  ;;  %s898_s20 = smov %s797_s27 }
 0x386   : > { %s899_s21 = smov %s786_s24  ;;  %17 = sbr.rel (!%p15_p3) target bundleno = 3 (0x3), region = 81 }
 0x38d   :  { %495 = vsyncpa [#allocation3], 1 }
 0x38e   :  { %497 = vsyncpa [#allocation3 + $0x1], 1 }

// kernel: tpu_custom_call.1
= control target key start
LH: loop header
LB: loop body
LE: loop exit
PB: predicated region body
PF: predicated region fallthrough
CT: control target
= control target key end

     0   :  { %10 = vsyncpa [#allocation3], 0  ;;  %s888_s0 = inlined_call_operand.vmem [shape: s32[16,4], index: 0, kind: input, shape index: {}]   ;;  %s889_s1 = inlined_call_operand.vmem [shape: f32[16,32], index: 1, kind: input, shape index: {}]   ;;  %s890_s2 = inlined_call_operand.vmem [shape: f32[16,32], index: 2, kind: input, shape index: {}]   ;;  %s891_s3 = inlined_call_operand.vmem [shape: f32[1,16], index: 3, kind: input, shape index: {}]   ;;  %s892_s4 = inlined_call_operand.vmem [shape: f32[32,16], index: 4, kind: input, shape index: {}]   ;;  %s893_s5 = inlined_call_operand.hbm [shape: f32[16,128], index: 5, kind: output, shape index: {}]  }
   0x1   :  { %12 = vsyncpa [#allocation3 + $0x1], 0  ;;  %s761_s18 = smov 0   ;;  %s763_s19 = smov 0  }
   0x2   :  { %s765_s20 = smov 0   ;;  %s767_s21 = smov 0  }
   0x3 LB: > { %s782_s22 = sadd.s32 4294967295, %s724_s21   ;;  %s560_s23 = sadd.s32 4294967294, %s724_s21   ;;  %s724_s21 = sphi %s767_s21, %s899_s21   ;;  %s720_s20 = sphi %s765_s20, %s898_s20   ;;  %s716_s19 = sphi %s763_s19, %s897_s19   ;;  %s712_s18 = sphi %s761_s18, %s896_s18  }
   0x4   : > { %s786_s24 = sadd.s32 1, %s724_s21   ;;  %s145_s25 = sadd.s32 1, %s720_s20 }
   0x5   : > { %s142_s26 = ssub.s32 %s724_s21, %s786_s24  ;;  %p155_p0 = scmp.ne.s32.totalorder %s720_s20, %s716_s19 }
   0x6   : > { %p143_p1 = scmp.eq.s32.totalorder %s142_s26, 0  ;;  %p156_p2 = scmp.eq.s32.totalorder %s782_s22, 1 }
   0x7   : > { %p161_p3 = scmp.ne.s32.totalorder %s716_s19, %s712_s18  ;;  %p162_p4 = scmp.eq.s32.totalorder %s560_s23, 1 }
   0x8   : > { %s797_s27 = scalar_select %p143_p1, %s720_s20, %s145_s25  }
   0x9   : > { %p799_p5 = por %p156_p2, %p155_p0  ;;  %p803_p6 = por %p162_p4, %p161_p3 }
   0xa   : > { %p563_p7 = scmp.ge.s32.totalorder %s724_s21, 1  ;;  %p207_p8 = scmp.lt.s32.totalorder %s724_s21, 3 }
   0xc   : > { %p208_p9 = pnand %p563_p7, %p207_p8 }
   0xd   : > { %p242_p10 = scmp.lt.s32.totalorder (!%p208_p9), %s782_s22, 1  ;;  %vm257_vm0 = vcmask (!%p208_p9), 261120   ;;  %v275_v6 = vld [vmem:[%s892_s4] sm:$0xff] (!%p208_p9)  ;;  %v276_v7 = vld [vmem:[%s892_s4 + $0x8] sm:$0xff] (!%p208_p9)  ;;  %v277_v8 = vld [vmem:[%s892_s4 + $0x10] sm:$0xff] (!%p208_p9)  ;;  %v370_v13 = vlaneseq (!%p208_p9)  ;;  %v726_v14 = vmov (!%p208_p9), 0  }
   0xe   : > { %211 = sbr.rel (%p208_p9) target bundleno = 895 (0x37f), region = 40  ;;  %v593_v9 = vpack.c.bf16 (!%p208_p9), %v276_v7, %v275_v6  ;;  %v278_v10 = vld [vmem:[%s892_s4 + $0x18] sm:$0xff] (!%p208_p9)  ;;  %644 = vset.pattern.permute.xlu1 (!%p208_p9), %v726_v14  ;;  %646 = vset.pattern.permute.xlu0 (!%p208_p9), %v726_v14  ;;  %v727_v21 = vmov (!%p208_p9), 1   ;;  %v728_v24 = vmov (!%p208_p9), 2   ;;  %v729_v25 = vmov (!%p208_p9), 3   ;;  %s239_s11 = sand.u32 (!%p208_p9), 1, %s716_s19  }
   0xf   : > { %v597_v11 = vpack.c.bf16 (!%p208_p9), %v278_v10, %v277_v8  ;;  %v371_v17 = vshrl.u32 (!%p208_p9), %v370_v13, 7  ;;  %v570_v41 = vld [vmem:[%s891_s3] ss:$0 sm:$0xff] (!%p208_p9)  ;;  %v383_v42 = vand.u32 (!%p208_p9), 127, %v370_v13  ;;  %vm394_vm11 = vcmask (!%p208_p9), 130048   ;;  %s573_s13 = sshll.u32 (!%p208_p9), %s782_s22, 7 }
  0x10   : > { %594 = vmatprep.subr.bf16.mxu0 (!%p208_p9), %v593_v9  ;;  %vm437_vm12 = vcmask (!%p208_p9), 7168   ;;  %vm439_vm13 = vcmask (!%p208_p9), 15360   ;;  %vm441_vm14 = vcmask (!%p208_p9), 23552   ;;  %vm443_vm15 = vcmask (!%p208_p9), 31744   ;;  %s846_s23 = scalar_lea.hbm (!%p208_p9), %s893_s5, %s573_s13  ;;  %s464_s25 = scalar_lea.sflag (!%p208_p9), [#allocation3], %s239_s11 }
  0x11   : > { %596 = vmatpush3.bf16.msra.mxu0 (!%p208_p9), %v593_v9 }
  0x12   : > { %598 = vmatprep.subr.bf16.mxu0 (!%p208_p9), %v597_v11 }
  0x15   : > { %s243_s30 = scalar_select %p242_p10, %s782_s22, 1  ;;  %600 = vmatpush3.bf16.msra.mxu0 %v597_v11 }
  0x17   : > { %s565_s6 = sshll.u32 %s243_s30, 3 }
  0x18   : > { %s249_s9 = scalar_lea.vmem %s889_s1, %s565_s6  ;;  %s253_s12 = scalar_lea.vmem %s890_s2, %s565_s6 }
  0x19   : > { %v254_v0 = vld [vmem:[%s249_s9] sm:$0xff]  ;;  %s245_s8 = scalar_lea.vmem %s888_s0, %s565_s6  ;;  %s571_s9 = sshll.u32 %s782_s22, 3 }
  0x1a   : > { %v256_v1 = vmul.f32 %v254_v0, %v254_v0  ;;  %v255_v2 = vld [vmem:[%s253_s12] sm:$0xff]  ;;  %v373_v15 = vstv %s571_s9  ;;  %s564_s12 = sshll.u32 %s239_s11, 3  ;;  %s730_s22 = smov [#allocation2]  }
  0x1b   : > { %v264_v3 = vmul.f32 %v255_v2, %v255_v2  ;;  %v369_v12 = vld [vmem:[%s245_s8] sm:$0xff]  ;;  %v374_v19 = vadd.s32 %v373_v15, %v371_v17  ;;  %s241_s14 = scalar_lea.vmem [#allocation2], %s564_s12  ;;  %s666_s30 = sshll.u32 %s730_s22, 4  ;;  %s667_s30 = int_to_ptr.vmem [resolvable:$false] %s666_s30 }
  0x1c   : > { %v258_v4 = vsel %vm257_vm0, %v256_v1, 0.0  ;;  %vm375_vm1 = vcmp.ge.s32.totalorder %v369_v12, 15  ;;  %s477_s15 = sshll.u32 %s241_s14, 4  ;;  %s668_s7 = scalar_lea.vmem %s667_s30, 256  ;;  %s848_s15 = int_to_ptr.vmem [resolvable:$true] %s477_s15 }
  0x1d   : > { %259 = vadd.xlane.f32.xlu0 %v258_v4  ;;  %v265_v5 = vsel %vm257_vm0, %v264_v3, 0.0  ;;  %v376_v16 = vsel %vm375_vm1, 1, %v726_v14  ;;  %s662_s26 = scalar_lea.vmem %s848_s15, 128  ;;  %p669_p0 = scmp.lt.s32.totalorder %s848_s15, %s667_s30 }
  0x1e   : > { %385 = vperm.xlu1 %644, %v376_v16   ;;  %v377_v18 = vmul.u32 15, %v376_v16  ;;  %p663_p11 = scmp.ne.s32.totalorder %s848_s15, %s662_s26  ;;  %p670_p1 = scmp.lt.s32.totalorder %s668_s7, %s662_s26 }
  0x20   : > { %v378_v20 = vsub.s32 %v369_v12, %v377_v18  ;;  %p664_p12 = pnand %p663_p11, %p799_p5  ;;  %p671_p2 = por %p670_p1, %p669_p0 }
  0x21   : > { %266 = vadd.xlane.f32.xlu0 %v265_v5 }
  0x22   : > { %645 = vset.pattern.permute.xlu1 %v727_v21  ;;  %vm379_vm2 = vcmp.ge.s32.totalorder %v378_v20, %v374_v19  ;;  %p665_p13 = pneg %p664_p12 }
  0x23   : > { %399 = vperm.xlu1 %645, %v376_v16   ;;  %v380_v22 = vsel %vm379_vm2, 1, %v726_v14 }
  0x24   : > { %v381_v23 = vadd.s32 %v380_v22, %v378_v20  ;;  %p672_p3 = pnand %p671_p2, %p665_p13 }
  0x27   : > { %647 = vset.pattern.permute.xlu1 %v728_v24 }
  0x28   : > { %412 = vperm.xlu1 %647, %v376_v16  }
  0x2c   : > { %648 = vset.pattern.permute.xlu1 %v727_v21 }
  0x2d   : > { %404 = vperm.xlu1 %648, %v381_v23  }
  0x31   : > { %649 = vset.pattern.permute.xlu1 %v728_v24 }
  0x32   : > { %417 = vperm.xlu1 %649, %v381_v23  }
  0x36   : > { %650 = vset.pattern.permute.xlu1 %v729_v25 }
  0x37   : > { %390 = vperm.xlu0 %646, %v381_v23   ;;  %425 = vperm.xlu1 %650, %v376_v16  }
  0x3b   : > { %651 = vset.pattern.permute.xlu0 %v729_v25  ;;  %430 = vperm.xlu1 %650, %v381_v23  }
  0x9d   : > { %v386_v35 = vpop.permute.xlu1 %385 }
  0x9e   : > { %vm387_vm3 = vcmp.eq.s32.totalorder %v386_v35, 1 }
  0xa2   : > { %v400_v36 = vpop.permute.xlu1 %399 }
  0xa3   : > { %vm401_vm8 = vcmp.eq.s32.totalorder %v400_v36, 1 }
  0xa7   : > { %v413_v37 = vpop.permute.xlu1 %412 }
  0xa8   : > { %vm414_vm9 = vcmp.eq.s32.totalorder %v413_v37, 1 }
  0xaa   : > { %v260_v26 = vpop.xlane.xlu0 %259 }
  0xab   : > { %v261_v27 = vmax.f32 %v260_v26, 1e-24 }
  0xac   : > { %v405_v38 = vpop.permute.xlu1 %404 }
  0xad   : > { %652 = vrsqrt.f32 %v261_v27  ;;  %vm406_vm10 = vcmp.eq.s32.totalorder %v383_v42, %v405_v38 }
  0xae   : > { %v267_v28 = vpop.xlane.xlu0 %266 }
  0xaf   : > { %v268_v29 = vmax.f32 %v267_v28, 1e-24 }
  0xb1   : > { %654 = vrsqrt.f32 %v268_v29  ;;  %v418_v39 = vpop.permute.xlu1 %417 }
  0xb2   : > { %vm419_vm5 = vcmp.eq.s32.totalorder %v383_v42, %v418_v39 }
  0xb6   : > { %v426_v40 = vpop.permute.xlu1 %425  ;;  %v391_v44 = vpop.permute.xlu0 %390 }
  0xb7   : > { %v653_v30 = vpop.eup %652  ;;  %vm427_vm4 = vcmp.eq.s32.totalorder %v426_v40, 1  ;;  %vm392_vm7 = vcmp.eq.s32.totalorder %v383_v42, %v391_v44 }
  0xb8   : > { %v263_v31 = vmul.f32 %v653_v30, %v254_v0 }
  0xba   : > { %590 = vmatprep.mubr.msk.f32.mxu0 %vm257_vm0, %v263_v31  ;;  %v431_v43 = vpop.permute.xlu1 %430 }
  0xbb   : > { %v655_v32 = vpop.eup %654  ;;  %vm432_vm6 = vcmp.eq.s32.totalorder %v383_v42, %v431_v43 }
  0xbc   : > { %v270_v33 = vmul.f32 %v655_v32, %v255_v2 }
  0xbe   : > { %591 = vmatmul.mubr.msk.f32.vlgmr.msra.gmra.mrb[0].mxu0 %vm257_vm0, %v270_v33  ;;  %v271_v34 = vmul.f32 %v270_v33, %v263_v31 }
  0xc0   : > { %v272_v61 = vsel %vm257_vm0, %v271_v34, 0.0 }
 0x191   : > { %v592_v45 = vpop.f32.mrb[0].mxu0 }
 0x192   : > { %v368_v46 = vmul.f32 %v592_v45, %v570_v41  ;;  %v351_v47 = vpop.f32.mrb[1].mxu0 }
 0x193   : > { %v367_v48 = vmul.f32 %v570_v41, %v351_v47 }
 0x195   : > { %v402_v49 = vsel %vm401_vm8, %v367_v48, %v368_v46  ;;  %v388_v50 = vsel %vm387_vm3, %v367_v48, %v368_v46  ;;  %v415_v51 = vsel %vm414_vm9, %v367_v48, %v368_v46  ;;  %v428_v52 = vsel %vm427_vm4, %v367_v48, %v368_v46 }
 0x196   : > { %v407_v53 = vsel %vm406_vm10, %v402_v49, 0.0  ;;  %v393_v54 = vsel %vm392_vm7, %v388_v50, 0.0  ;;  %v420_v55 = vsel %vm419_vm5, %v415_v51, 0.0  ;;  %v433_v56 = vsel %vm432_vm6, %v428_v52, 0.0 }
 0x197   : > { %v408_v57 = vsel %vm394_vm11, %v407_v53, 0.0  ;;  %v395_v58 = vsel %vm394_vm11, %v393_v54, 0.0  ;;  %v421_v59 = vsel %vm394_vm11, %v420_v55, 0.0  ;;  %v434_v60 = vsel %vm394_vm11, %v433_v56, 0.0 }
 0x198   : > { %409 = vadd.xlane.f32.xlu0 %v408_v57  ;;  %396 = vadd.xlane.f32.xlu1 %v395_v58 }
 0x19c   : > { %422 = vadd.xlane.f32.xlu1 %v421_v59 }
 0x1a0   : > { %435 = vadd.xlane.f32.xlu1 %v434_v60 }
 0x1a4   : > { %273 = vadd.xlane.f32.xlu1 %v272_v61 }
 0x225   : > { %v397_v62 = vpop.xlane.xlu1 %396  ;;  %v410_v63 = vpop.xlane.xlu0 %409 }
 0x226   : > { %v438_v1 = vsel %vm437_vm12, %v397_v62, %v410_v63 }
 0x229   : > { %v423_v0 = vpop.xlane.xlu1 %422 }
 0x22a   : > { %v440_v2 = vsel %vm439_vm13, %v438_v1, %v423_v0 }
 0x22d   : > { %v436_v3 = vpop.xlane.xlu1 %435 }
 0x22e   : > { %v442_v4 = vsel %vm441_vm14, %v440_v2, %v436_v3 }
 0x22f   : > { %v444_v5 = vsel %vm443_vm15, %v442_v4, -inf }
 0x230   : > { %445 = vmax.xlane.f32.xlu1 %v444_v5 }
 0x231   : > { %v274_v6 = vpop.xlane.xlu1 %273 }
 0x2bd   : > { %v446_v7 = vpop.xlane.xlu1 %445 }
 0x2be   : > { %v447_v8 = vmax.f32 %v274_v6, %v446_v7 }
 0x2c0   : > { %v451_v9 = vsub.f32 %v442_v4, %v447_v8  ;;  %v448_v13 = vsub.f32 %v274_v6, %v447_v8 }
 0x2c2   : > { %v452_v10 = vmul.f32 1.442695, %v451_v9  ;;  %v449_v14 = vmul.f32 1.442695, %v448_v13 }
 0x2c4   : > { %656 = vpow2.f32 %v452_v10 }
 0x2c5   : > { %658 = vpow2.f32 %v449_v14 }
 0x2ce   : > { %v657_v11 = vpop.eup %656 }
 0x2cf   : > { %v454_v12 = vsel %vm443_vm15, %v657_v11, 0.0  ;;  %v659_v15 = vpop.eup %658 }
 0x2d0   : > { %455 = vadd.xlane.f32.xlu1 %v454_v12 }
 0x35d   : > { %v456_v16 = vpop.xlane.xlu1 %455 }
 0x35e   : > { %v457_v17 = vadd.f32 %v659_v15, %v456_v16 }
 0x360   : > { %660 = vlog2.f32 %v457_v17 }
 0x36a   : > { %v661_v18 = vpop.eup %660 }
 0x36b   : > { %v459_v19 = vmul.f32 0.6931472, %v661_v18 }
 0x36d   : > { %v460_v20 = vadd.f32 %v459_v19, %v447_v8 }
 0x36f   : > { %v461_v21 = vsub.f32 %v460_v20, %v274_v6 }
 0x371   : > { %462 = vst [vmem:[%s241_s14] sm:$0xff] %v461_v21 }
 0x372   : > { %675 = shalt.err (!%p672_p3)
}
 0x373   : > { %s676_s8 = scalar_lea.hbm %s846_s23, 128  ;;  %s680_s10 = scalar_lea.hbm %s893_s5, 256 }
 0x374   : > { %p677_p4 = scmp.ne.s32.totalorder %s846_s23, %s676_s8  ;;  %p681_p9 = scmp.lt.u32.totalorder %s846_s23, %s893_s5 }
 0x375   : > { %p682_p10 = scmp.lt.u32.totalorder %s680_s10, %s676_s8  ;;  %p684_p12 = scmp.lt.u32.totalorder %s676_s8, %s846_s23 }
 0x376   : > { %p678_p7 = pnand %p677_p4, %p799_p5 }
 0x377   : > { %p683_p11 = por %p682_p10, %p681_p9 }
 0x378   : > { %p679_p8 = pneg %p678_p7 }
 0x379   : > { %p685_p13 = por %p684_p12, %p683_p11 }
 0x37b   : > { %p686_p0 = pnand %p685_p13, %p679_p8 }
 0x37d   : > { %689 = shalt.err (!%p686_p0)
}
 0x37e   : > { %601 = dma.vmem_to_hbm [thread:$0]  (%p799_p5), %s848_s15, 128, %s846_s23, %s464_s25  }
 0x37f PF: > { %p607_p1 = scmp.ge.s32.totalorder %s724_s21, 2  ;;  %s489_s13 = sand.u32 1, %s712_s18  }
 0x380   : > { %s490_s14 = scalar_lea.sflag [#allocation3], %s489_s13 }
 0x381   : > { %p604_p2 = pnand %p607_p1, %p803_p6 }
 0x383   : > { %707 = dma.done.wait (!%p604_p2), %s490_s14, 128  }
 0x384   : > { %709 = vsyncadd (!%p604_p2), %s490_s14, 4294967168  ;;  %p15_p3 = scmp.ge.s32.totalorder %s786_s24, 4   ;;  %s896_s18 = smov %s716_s19 }
 0x385   : > { %s897_s19 = smov %s720_s20  ;;  %s898_s20 = smov %s797_s27 }
 0x386   : > { %s899_s21 = smov %s786_s24  ;;  %17 = sbr.rel (!%p15_p3) target bundleno = 3 (0x3), region = 81 }
 0x38d   :  { %495 = vsyncpa [#allocation3], 1 }
 0x38e   :  { %497 = vsyncpa [#allocation3 + $0x1], 1 }

</bundles_post_ra>
